<compile_context>
chip_gen: v6e
topology: v6e:2x2x1
jax: 0.10.0
libtpu: 0.0.40
codegen_flags: <defaults>
</compile_context>

<pallas_src>
import functools

import jax
import jax.numpy as jnp
from jax.experimental import pallas as pl
from jax.experimental.pallas import tpu as pltpu

LANE = 128
TARGET_BLOCK_BYTES = 8 * 1024 * 1024   # per input block; pipeline peak ~4x this


def _round_up(a: int, b: int) -> int:
    return ((a + b - 1) // b) * b


def _smelu_kernel(x_ref, o_ref, *, beta: float, two_beta: float, inv_4beta: float):
    x = x_ref[...]
    # Native-dtype math for floats (bf16 VALU on v6e/v7x; Mosaic transparently
    # widens on v5e).  Integer inputs are computed in f32 and truncated back.
    if not jnp.issubdtype(x.dtype, jnp.floating):
        x = x.astype(jnp.float32)
    # Branchless form (6 VPU ops, no abs/cmp/select):
    #   t = clamp(x + beta, 0, 2*beta);  q = t*t / (4*beta);  out = max(x, q)
    # On [-beta, beta]: q = (x+beta)^2/(4beta) >= x, so max picks q.
    # For x >  beta: q == beta <= x, so max picks x (== relu(x)).
    # For x < -beta: t == 0 -> q == 0 >= x, so max picks 0 (== relu(x)).
    t = jnp.minimum(jnp.maximum(x + beta, 0.0), two_beta)
    o_ref[...] = jnp.maximum(x, t * t * inv_4beta).astype(o_ref.dtype)


def _smelu_jnp(x: jnp.ndarray, beta: float) -> jnp.ndarray:
    """Plain-JAX fallback (sub-128-element tails / degenerate shapes)."""
    xf = x if jnp.issubdtype(x.dtype, jnp.floating) else x.astype(jnp.float32)
    out = jnp.where(jnp.abs(xf) <= beta,
                    (xf + beta) * (xf + beta) * (1.0 / (4.0 * beta)),
                    jnp.maximum(xf, 0))
    return out.astype(x.dtype)


def smelu(x: jnp.ndarray, beta: float = 2.0) -> jnp.ndarray:
    """SmeLU activation. Accepts any shape (e.g. NCHW); returns same shape/dtype."""
    beta = abs(float(beta))
    if beta == 0.0:
        # Quadratic branch would divide by zero; SmeLU(beta=0) == ReLU.
        return jnp.maximum(x, 0).astype(x.dtype)
    two_beta = 2.0 * beta
    inv_4beta = 1.0 / (4.0 * beta)

    orig_shape = x.shape
    orig_dtype = x.dtype

    flat = x.reshape(-1)                     # free (bitcast) for contiguous inputs
    n = flat.shape[0]
    n_main = (n // LANE) * LANE              # lane-aligned prefix handled by the kernel

    if n_main == 0:
        return _smelu_jnp(flat, beta).reshape(orig_shape)

    rows = n_main // LANE
    x2d = flat.reshape(rows, LANE) if n_main == n else flat[:n_main].reshape(rows, LANE)

    itemsize = jnp.dtype(orig_dtype).itemsize
    # dtype-aware sublane packing: f32 -> 8 rows/vreg, bf16 -> 16, int8/fp8 -> 32.
    sublane = 8 * max(1, 4 // itemsize)
    # Largest block (~TARGET_BLOCK_BYTES), floored to a multiple of `sublane`.
    max_block_rows = max(sublane,
                         (TARGET_BLOCK_BYTES // (LANE * itemsize)) // sublane * sublane)

    if rows < 2 * sublane:
        block_rows = rows                    # block == full extent -> always legal
    else:
        # >=2 (and even) roughly-equal blocks: megacore balance on v7x, no tiny
        # ragged trailing block, blocks capped at ~TARGET_BLOCK_BYTES.
        num_blocks = max(2, pl.cdiv(rows, max_block_rows))
        if num_blocks % 2:
            num_blocks += 1
        block_rows = min(max_block_rows,
                         _round_up(pl.cdiv(rows, num_blocks), sublane))
    grid = (pl.cdiv(rows, block_rows),)

    out2d = pl.pallas_call(
        functools.partial(_smelu_kernel, beta=beta, two_beta=two_beta,
                          inv_4beta=inv_4beta),
        out_shape=jax.ShapeDtypeStruct((rows, LANE), orig_dtype),
        grid=grid,
        in_specs=[pl.BlockSpec((block_rows, LANE), lambda i: (i, 0))],
        out_specs=pl.BlockSpec((block_rows, LANE), lambda i: (i, 0)),
        compiler_params=pltpu.CompilerParams(
            dimension_semantics=("parallel",),   # megacore sharding (free 2x on v7x)
            vmem_limit_bytes=48 << 20,           # fits v5e/v6e (128 MiB) and v7x (64 MiB)
        ),
    )(x2d)

    if n_main == n:
        # Common case for NN activations: zero extra HBM passes.
        return out2d.reshape(orig_shape)
    # Sub-128-element tail: plain-jnp tail + concatenate.  Costs one extra HBM
    # pass but only triggers for sizes that are not multiples of 128; the
    # aligned path above is copy-free.
    tail_out = _smelu_jnp(flat[n_main:], beta)
    return jnp.concatenate([out2d.reshape(-1), tail_out]).reshape(orig_shape)


def smelu_ref(x: jnp.ndarray, beta: float = 2.0) -> jnp.ndarray:
    beta = abs(float(beta))
    return jnp.where(jnp.abs(x) <= beta, (x + beta) ** 2 / (4.0 * beta),
                     jnp.maximum(x, 0.0)).astype(x.dtype)


if __name__ == "__main__":
    key = jax.random.PRNGKey(0)

    # NCHW input consistent with a conv-net activation: batch=2, channels=4, 16x16 spatial.
    x = jax.random.normal(key, (2, 4, 16, 16), dtype=jnp.float32) * 3.0
    out = smelu(x, beta=2.0)
    jax.block_until_ready(out)
    ref = smelu_ref(x, beta=2.0)
    assert out.shape == x.shape and out.dtype == x.dtype
    assert jnp.allclose(out, ref, atol=1e-6, rtol=1e-6), "mismatch vs reference (aligned case)"

    # Lane-misaligned size exercises the jnp tail path.
    x2 = jax.random.normal(jax.random.PRNGKey(1), (3, 5, 7, 11), dtype=jnp.float32) * 3.0
    out2 = smelu(x2, beta=2.0)
    jax.block_until_ready(out2)
    assert jnp.allclose(out2, smelu_ref(x2, beta=2.0), atol=1e-6, rtol=1e-6), \
        "mismatch vs reference (ragged case)"

    # bf16 path: native bf16 VPU math on v6e/v7x.
    x3 = (jax.random.normal(jax.random.PRNGKey(2), (2, 4, 16, 16)) * 3.0).astype(jnp.bfloat16)
    out3 = smelu(x3, beta=2.0)
    jax.block_until_ready(out3)
    assert out3.dtype == jnp.bfloat16
    assert jnp.allclose(out3.astype(jnp.float32),
                        smelu_ref(x3.astype(jnp.float32), beta=2.0),
                        atol=3e-2, rtol=3e-2), "mismatch vs reference (bf16 case)"

    print("KERNEL_OK")
</pallas_src>

<mosaic_0001>
module attributes {stable_mosaic.version = 11 : i64} {
  func.func @_smelu_kernel(%arg0: i32, %arg1: memref<8x128xf32, #tpu.memory_space<vmem>>, %arg2: memref<8x128xf32, #tpu.memory_space<vmem>>) attributes {dimension_semantics = [#tpu.dimension_semantics<parallel>], iteration_bounds = array<i64: 2>, scalar_prefetch = 0 : i64, scratch_operands = 0 : i64, tpu.core_type = #tpu.core_type<tc>, window_params = [{transform_indices = @transform_0, window_bounds = array<i64: 8, 128>}, {transform_indices = @transform_1, window_bounds = array<i64: 8, 128>}]} {
    %c0 = arith.constant 0 : index
    %c0_0 = arith.constant 0 : index
    %0 = vector.load %arg1[%c0, %c0_0] : memref<8x128xf32, #tpu.memory_space<vmem>>, vector<8x128xf32>
    %cst = arith.constant 2.000000e+00 : f32
    %1 = vector.broadcast %cst : f32 to vector<8x128xf32>
    %2 = arith.addf %0, %1 : vector<8x128xf32>
    %cst_1 = arith.constant 0.000000e+00 : f32
    %3 = vector.broadcast %cst_1 : f32 to vector<8x128xf32>
    %4 = arith.maximumf %2, %3 : vector<8x128xf32>
    %cst_2 = arith.constant 4.000000e+00 : f32
    %5 = vector.broadcast %cst_2 : f32 to vector<8x128xf32>
    %6 = arith.minimumf %4, %5 : vector<8x128xf32>
    %7 = arith.mulf %6, %6 : vector<8x128xf32>
    %cst_3 = arith.constant 1.250000e-01 : f32
    %8 = vector.broadcast %cst_3 : f32 to vector<8x128xf32>
    %9 = arith.mulf %7, %8 : vector<8x128xf32>
    %10 = arith.maximumf %0, %9 : vector<8x128xf32>
    %c0_4 = arith.constant 0 : index
    %c0_5 = arith.constant 0 : index
    %11 = vector.load %arg2[%c0_4, %c0_5] : memref<8x128xf32, #tpu.memory_space<vmem>>, vector<8x128xf32>
    tpu.vector_store %arg2[%c0_4, %c0_5], %10 {strides = array<i32>} : memref<8x128xf32, #tpu.memory_space<vmem>>, vector<8x128xf32>,
    return
  }
  func.func @transform_0(%arg0: i32) -> (i32, i32) {
    %c0_i32 = arith.constant 0 : i32
    %c0_i32_0 = arith.constant 0 : i32
    return %arg0, %c0_i32 : i32, i32
  }
  func.func @transform_1(%arg0: i32) -> (i32, i32) {
    %c0_i32 = arith.constant 0 : i32
    %c0_i32_0 = arith.constant 0 : i32
    return %arg0, %c0_i32 : i32, i32
  }
}

</mosaic_0001>

<bundles_post_ra>
// kernel: tpu_custom_call.1
= control target key start
LH: loop header
LB: loop body
LE: loop exit
PB: predicated region body
PF: predicated region fallthrough
CT: control target
= control target key end

     0   :  { %6 = vsyncpa [#allocation3], 0  ;;  %s529_s0 = inlined_call_operand.hbm [shape: f32[16,128], index: 0, kind: input, shape index: {}]   ;;  %s530_s1 = inlined_call_operand.hbm [shape: f32[16,128], index: 1, kind: output, shape index: {}]  }
   0x1   :  { %8 = vsyncpa [#allocation3 + $0x1], 0 }
   0x2   :  { %9 = vsyncpa [#allocation4], 0 }
   0x3   :  { %11 = vsyncpa [#allocation4 + $0x1], 0  ;;  %s388_s6 = smov 0   ;;  %s390_s7 = smov 0  }
   0x4   :  { %s392_s8 = smov 0   ;;  %s394_s9 = smov 0  }
   0x5 LB: > { %s409_s10 = sadd.s32 4294967295, %s374_s9   ;;  %s224_s11 = sadd.s32 4294967294, %s374_s9   ;;  %s374_s9 = sphi %s394_s9, %s547_s9   ;;  %s370_s8 = sphi %s392_s8, %s546_s8   ;;  %s366_s7 = sphi %s390_s7, %s545_s7   ;;  %s362_s6 = sphi %s388_s6, %s544_s6  }
   0x6   : > { %s413_s12 = sadd.s32 1, %s374_s9   ;;  %s24_s13 = sadd.s32 1, %s370_s8 }
   0x7   : > { %s21_s14 = ssub.s32 %s374_s9, %s413_s12  ;;  %p31_p0 = scmp.ne.s32.totalorder %s370_s8, %s366_s7 }
   0x8   : > { %p22_p1 = scmp.eq.s32.totalorder %s21_s14, 0  ;;  %p32_p2 = scmp.eq.s32.totalorder %s374_s9, 0 }
   0x9   : > { %p37_p3 = scmp.ne.s32.totalorder %s366_s7, %s362_s6  ;;  %p38_p4 = scmp.eq.s32.totalorder %s409_s10, 0 }
   0xa   : > { %s425_s15 = scalar_select %p22_p1, %s370_s8, %s24_s13  }
   0xb   : > { %p427_p5 = por %p32_p2, %p31_p0  ;;  %p431_p6 = por %p38_p4, %p37_p3 }
   0xc   : > { %p61_p7 = scmp.eq.s32.totalorder %s409_s10, 1  ;;  %p67_p8 = scmp.eq.s32.totalorder %s224_s11, 1 }
   0xd   : > { %s534_s17 = scalar_select %p431_p6, 1, 0 }
   0xe   : > { %p248_p10 = scmp.lt.s32.totalorder %s374_s9, 2  ;;  %p438_p11 = por %p61_p7, %p31_p0 }
   0xf   : > { %p442_p12 = por %p67_p8, %p37_p3  ;;  %s87_s20 = sand.u32 1, %s370_s8  }
  0x10   : > { %s535_s18 = scalar_select %p438_p11, 1, 0 }
  0x11   : > { %s536_s19 = scalar_select %p442_p12, 1, 0 }
  0x12   : > { %s228_s21 = sshll.u32 %s374_s9, 7  ;;  %s227_s22 = sshll.u32 %s87_s20, 3 }
  0x13   : > { %s451_s25 = scalar_lea.hbm %s529_s0, %s228_s21  ;;  %s91_s26 = scalar_lea.vmem [#allocation2], %s227_s22 }
  0x14   : > { %s98_s27 = sshll.u32 %s91_s26, 4  ;;  %p455_p13 = pnand %p248_p10, %p427_p5  ;;  %s459_s27 = int_to_ptr.vmem [resolvable:$true] %s98_s27 }
  0x15   : > { %s88_s29 = scalar_lea.sflag [#allocation3], %s87_s20  ;;  %s282_s30 = scalar_lea.hbm %s451_s25, 128 }
  0x16   : > { %p283_p2 = scmp.ne.s32.totalorder %s451_s25, %s282_s30  ;;  %p284_p3 = pneg %p455_p13 }
  0x17   : > { %s287_s4 = scalar_lea.hbm %s529_s0, 256  ;;  %p288_p5 = scmp.lt.s32.totalorder %s451_s25, %s529_s0 }
  0x18   : > { %p285_p4 = pnand %p284_p3, %p283_p2  ;;  %p289_p8 = scmp.lt.s32.totalorder %s287_s4, %s282_s30 }
  0x1a   : > { %p286_p7 = pneg %p285_p4  ;;  %p290_p10 = por %p289_p8, %p288_p5 }
  0x1c   : > { %p291_p9 = pnand %p290_p10, %p286_p7 }
  0x1e   : > { %294 = shalt.err (!%p291_p9)
}
  0x1f   : > { %s295_s13 = scalar_lea.vmem %s459_s27, 128  ;;  %s376_s14 = smov [#allocation2]  }
  0x20   : > { %p296_p0 = scmp.ne.s32.totalorder %s459_s27, %s295_s13  ;;  %s300_s16 = sshll.u32 %s376_s14, 4  ;;  %s301_s16 = int_to_ptr.vmem [resolvable:$false] %s300_s16 }
  0x21   : > { %s302_s20 = scalar_lea.vmem %s301_s16, 256  ;;  %p303_p4 = scmp.lt.s32.totalorder %s459_s27, %s301_s16 }
  0x22   : > { %p298_p1 = pnand %p296_p0, %p284_p3  ;;  %p304_p12 = scmp.lt.s32.totalorder %s302_s20, %s295_s13 }
  0x24   : > { %p299_p2 = pneg %p298_p1  ;;  %p305_p11 = por %p304_p12, %p303_p4 }
  0x26   : > { %p306_p6 = pnand %p305_p11, %p299_p2 }
  0x28   : > { %309 = shalt.err (!%p306_p6)
}
  0x29   : > { %243 = dma.hbm_to_vmem [thread:$0]  (!%p455_p13), %s451_s25, 128, %s459_s27, %s88_s29  }
  0x2a   : > { %p538_p9 = scmp.lt.s32.totalorder %s374_s9, 3  ;;  %p539_p7 = scmp.ge.s32.totalorder %s374_s9, 1 }
  0x2c   : > { %p104_p0 = pnand %p539_p7, %p538_p9 }
  0x2d   : > { %s486_s21 = sand.u32 (!%p104_p0), 1, %s366_s7   ;;  %p540_p6 = scmp.ne.s32.totalorder (!%p104_p0), %s534_s17, 0 }
  0x2e   : > { %107 = sbr.rel (%p104_p0) target bundleno = 78 (0x4e), region = 24  ;;  %s230_s22 = sshll.u32 (!%p104_p0), %s486_s21, 3 }
  0x2f   : > { %s110_s23 = scalar_lea.sflag (!%p104_p0), [#allocation3], %s486_s21  ;;  %s113_s24 = scalar_lea.vmem (!%p104_p0), [#allocation2], %s230_s22 }
  0x33   : > { %353 = dma.done.wait (%p540_p6), %s110_s23, 128  }
  0x34   : > { %355 = vsyncadd (%p540_p6), %s110_s23, 4294967168  ;;  %v132_v0 = vld [vmem:[%s113_s24] sm:$0xff]  ;;  %s131_s25 = scalar_lea.vmem [#allocation5], %s230_s22  ;;  %s233_s27 = sshll.u32 %s409_s10, 7 }
  0x35   : > { %v133_v1 = vadd.f32 2.0, %v132_v0  ;;  %s154_s26 = sshll.u32 %s131_s25, 4  ;;  %s152_s30 = scalar_lea.hbm %s530_s1, %s233_s27  ;;  %s155_s26 = int_to_ptr.vmem [resolvable:$true] %s154_s26 }
  0x36   : > { %s141_s17 = scalar_lea.sflag [#allocation4], %s486_s21  ;;  %s310_s2 = scalar_lea.vmem %s155_s26, 128 }
  0x37   : > { %v134_v2 = vmax.f32 %v133_v1, 0.0  ;;  %p311_p11 = scmp.ne.s32.totalorder %s155_s26, %s310_s2  ;;  %p541_p12 = scmp.ne.s32.totalorder %s535_s18, 0 }
  0x38   : > { %s377_s3 = smov [#allocation5]  }
  0x39   : > { %v135_v3 = vmin.f32 %v134_v2, 4.0  ;;  %p312_p13 = pnand %p311_p11, %p541_p12  ;;  %s314_s4 = sshll.u32 %s377_s3, 4  ;;  %s315_s4 = int_to_ptr.vmem [resolvable:$false] %s314_s4 }
  0x3a   : > { %s316_s5 = scalar_lea.vmem %s315_s4, 256  ;;  %p317_p3 = scmp.lt.s32.totalorder %s155_s26, %s315_s4 }
  0x3b   : > { %v136_v4 = vmul.f32 %v135_v3, %v135_v3  ;;  %p313_p1 = pneg %p312_p13  ;;  %p318_p5 = scmp.lt.s32.totalorder %s316_s5, %s310_s2 }
  0x3d   : > { %v137_v5 = vmul.f32 0.125, %v136_v4  ;;  %p319_p8 = por %p318_p5, %p317_p3 }
  0x3f   : > { %v138_v6 = vmax.f32 %v132_v0, %v137_v5  ;;  %p320_p10 = pnand %p319_p8, %p313_p1 }
  0x41   : > { %139 = vst [vmem:[%s131_s25] sm:$0xff] %v138_v6 }
  0x42   : > { %323 = shalt.err (!%p320_p10)
}
  0x43   : > { %s324_s10 = scalar_lea.hbm %s152_s30, 128  ;;  %s328_s14 = scalar_lea.hbm %s530_s1, 256 }
  0x44   : > { %p325_p2 = scmp.ne.s32.totalorder %s152_s30, %s324_s10  ;;  %p329_p7 = scmp.lt.s32.totalorder %s152_s30, %s530_s1 }
  0x45   : > { %p330_p0 = scmp.lt.s32.totalorder %s328_s14, %s324_s10 }
  0x46   : > { %p326_p4 = pnand %p325_p2, %p541_p12 }
  0x47   : > { %p331_p6 = por %p330_p0, %p329_p7 }
  0x48   : > { %p327_p9 = pneg %p326_p4 }
  0x4a   : > { %p332_p11 = pnand %p331_p6, %p327_p9 }
  0x4c   : > { %335 = shalt.err (!%p332_p11)
}
  0x4d   : > { %238 = dma.vmem_to_hbm [thread:$0]  (%p541_p12), %s155_s26, 128, %s152_s30, %s141_s17  }
  0x4e PF: > { %s166_s21 = sand.u32 1, %s362_s6   ;;  %p542_p13 = scmp.ne.s32.totalorder %s536_s19, 0 }
  0x4f   : > { %p543_p1 = scmp.ge.s32.totalorder %s374_s9, 2  ;;  %s167_s22 = scalar_lea.sflag [#allocation4], %s166_s21 }
  0x51   : > { %p245_p3 = pnand %p543_p1, %p542_p13 }
  0x53   : > { %p246_p5 = pneg %p245_p3 }
  0x55   : > { %357 = dma.done.wait (%p246_p5), %s167_s22, 128  }
  0x56   : > { %359 = vsyncadd (%p246_p5), %s167_s22, 4294967168  ;;  %p14_p8 = scmp.ge.s32.totalorder %s413_s12, 4   ;;  %s544_s6 = smov %s366_s7 }
  0x57   : > { %s545_s7 = smov %s370_s8  ;;  %s546_s8 = smov %s425_s15 }
  0x58   : > { %s547_s9 = smov %s413_s12  ;;  %16 = sbr.rel (!%p14_p8) target bundleno = 5 (0x5), region = 69 }
  0x5d   :  { %172 = vsyncpa [#allocation3], 1 }
  0x5e   :  { %174 = vsyncpa [#allocation3 + $0x1], 1 }
  0x5f   :  { %175 = vsyncpa [#allocation4], 1 }
  0x60   :  { %177 = vsyncpa [#allocation4 + $0x1], 1 }

</bundles_post_ra>
